<compile_context>
chip_gen: v6e
topology: v6e:2x2x1
jax: 0.10.0
libtpu: 0.0.40
codegen_flags: <defaults>
</compile_context>

<pallas_src>
import functools

import jax
import jax.numpy as jnp
from jax.experimental import pallas as pl
from jax.experimental.pallas import tpu as pltpu


def _round_up(x, m):
    return ((x + m - 1) // m) * m


def _vmem_capacity_bytes():
    """Best-effort physical-VMEM query; conservative (v7x) fallback."""
    try:
        info = pltpu.get_tpu_info()
        cap = getattr(info, "vmem_capacity_bytes", None)
        if cap:
            return int(cap)
    except Exception:
        pass
    return 64 * 1024 * 1024


def _ce_partial_kernel(logits_ref, labels_ref, out_ref, *, n_valid):
    # logits_ref: (TN, C) native dtype in VMEM ; labels_ref: (TN, 1) int32 in VMEM
    # out_ref:   (1, 1) f32 partial-sum slot in SMEM (one per grid tile).
    logits = logits_ref[...]                                  # native dtype
    labels = labels_ref[...]                                  # (TN, 1) int32
    tn, c = logits.shape

    # Global row index -> mask for (a) the ragged last block and (b) any
    # tiny-N padding. Select (not multiply) so tail garbage/NaN cannot leak.
    row = jax.lax.broadcasted_iota(jnp.int32, (tn, 1), 0) + pl.program_id(0) * tn
    valid = row < n_valid                                     # (TN, 1) bool

    # Row max + shift in the native dtype (bf16 stays bf16 on v6e/v7x VPUs).
    m = jnp.max(logits, axis=1, keepdims=True)                # (TN, 1)
    shifted = logits - m                                      # (TN, C), <= 0

    # Target-logit gather fused onto the shifted tile (no one-hot materialize,
    # no `+ m` round trip). Exactly one nonzero per row -> sum is exact.
    col = jax.lax.broadcasted_iota(jnp.int32, (tn, c), 1)     # (TN, C)
    true_shifted = jnp.sum(
        jnp.where(col == labels, shifted, jnp.zeros_like(shifted)),
        axis=1, keepdims=True).astype(jnp.float32)            # (TN, 1)

    # exp/log in f32 on the EUP; cast only right before exp.
    p = jnp.exp(shifted.astype(jnp.float32))                  # (TN, C) f32
    lse_shifted = jnp.log(jnp.sum(p, axis=1, keepdims=True))  # (TN, 1) f32

    per_sample = jnp.where(valid, lse_shifted - true_shifted, 0.0)
    out_ref[0, 0] = jnp.sum(per_sample)


def cross_entropy_loss(prediction, label, reduction="mean"):
    """Pallas equivalent of the BaseModule.loss() docstring example:
        nn.CrossEntropyLoss(reduction=reduction)(prediction, label.squeeze().long())
    prediction: [N, C] float (f32 or bf16), label: [N] (or [N,1]) integer classes.
    Returns a scalar ('mean' or 'sum' reduction).
    """
    if reduction not in ("mean", "sum"):
        raise NotImplementedError(reduction)

    n, c = prediction.shape
    # label.squeeze().long()  ->  (N, 1) int32 column for the in-kernel compare.
    labels = jnp.reshape(label, (-1, 1)).astype(jnp.int32)
    itemsize = jnp.dtype(prediction.dtype).itemsize

    # Tiny-N edge case only: pad up to one 16-row group (covers bf16 sublane
    # packing). Large arrays are NEVER copied -- the ragged last block is
    # masked inside the kernel instead.
    n_rows = n
    if n_rows < 16:
        pad = 16 - n_rows
        prediction = jnp.pad(prediction, ((0, pad), (0, 0)))
        labels = jnp.pad(labels, ((0, pad), (0, 0)))
        n_rows = 16

    # ---- generation-aware tile / VMEM budgets -------------------------------
    vmem_cap = _vmem_capacity_bytes()
    if vmem_cap >= 96 * 1024 * 1024:
        # v5e / v6e: 128 MiB physical VMEM -> big tiles, fewer grid steps.
        tile_budget = 8 * 1024 * 1024     # f32-equivalent bytes per logits tile
        vmem_limit = 64 * 1024 * 1024
    else:
        # v7x: 64 MiB per TensorCore -> leave room for 2x double-buffered input
        # plus ~3x tile of (TN,C) f32 intermediates (shifted/exp/iota).
        tile_budget = 4 * 1024 * 1024
        vmem_limit = 48 * 1024 * 1024

    # Budget counted in f32 bytes so the in-kernel f32 intermediates stay
    # bounded by the same figure regardless of the streamed input dtype.
    budget_rows = max(16, (tile_budget // max(1, c * 4)) // 16 * 16)
    num_tiles = max(1, pl.cdiv(n_rows, budget_rows))
    if num_tiles == 1 and n_rows >= 256:
        num_tiles = 2                      # keep both v7x TensorCores busy
    tn = _round_up(pl.cdiv(n_rows, num_tiles), 16)
    tn = min(tn, (n_rows // 16) * 16)      # block never exceeds the array
    num_tiles = pl.cdiv(n_rows, tn)

    kernel = functools.partial(_ce_partial_kernel, n_valid=n)

    partials = pl.pallas_call(
        kernel,
        out_shape=jax.ShapeDtypeStruct((num_tiles, 1), jnp.float32),
        grid_spec=pl.GridSpec(
            grid=(num_tiles,),
            in_specs=[
                pl.BlockSpec((tn, c), lambda i: (i, 0)),   # streamed logits tile
                pl.BlockSpec((tn, 1), lambda i: (i, 0)),   # labels column
            ],
            out_specs=pl.BlockSpec(
                (1, 1), lambda i: (i, 0), memory_space=pltpu.SMEM  # per-tile partial
            ),
        ),
        compiler_params=pltpu.CompilerParams(
            dimension_semantics=("parallel",),   # independent tiles -> megacore OK
            vmem_limit_bytes=vmem_limit,
        ),
        cost_estimate=pl.CostEstimate(
            flops=int(5 * n * c),
            transcendentals=int(n * c + n),
            bytes_accessed=int(n * c * itemsize + n * 4 + num_tiles * 4),
        ),
    )(prediction, labels)

    total = jnp.sum(partials)
    if reduction == "mean":
        return total / jnp.float32(n)
    return total


class BaseModuleJax:
    """JAX/Pallas port of BaseModule. Keeps the same surface; checkpoint I/O
    helpers (save/load via pt_util) are host-side file ops and out of scope."""

    def __init__(self):
        self.best_accuracy = 0

    def forward(self, *inputs):
        raise NotImplementedError  # matches the PyTorch base class exactly

    def loss(self, prediction, label, reduction="mean"):
        return cross_entropy_loss(prediction, label, reduction)


if __name__ == "__main__":
    key = jax.random.PRNGKey(0)
    k_logits, k_labels, k_logits2, k_labels2 = jax.random.split(key, 4)

    module = BaseModuleJax()

    # --- small demo shape: batch=8, classes=32 (f32) ---
    N, C = 8, 32
    logits = jax.random.normal(k_logits, (N, C), dtype=jnp.float32)
    labels = jax.random.randint(k_labels, (N,), 0, C, dtype=jnp.int32)

    loss = jax.block_until_ready(module.loss(logits, labels, reduction="mean"))
    ref = jnp.mean(
        jax.nn.logsumexp(logits, axis=1)
        - jnp.take_along_axis(logits, labels[:, None], axis=1)[:, 0]
    )
    assert jnp.allclose(loss, ref, rtol=1e-5, atol=1e-5), (loss, ref)

    # bf16 logits streamed as-is: max/shift/gather in bf16, exp/log in f32.
    logits_bf16 = logits.astype(jnp.bfloat16)
    loss_bf16 = jax.block_until_ready(module.loss(logits_bf16, labels))
    ref_bf16 = jnp.mean(
        jax.nn.logsumexp(logits_bf16.astype(jnp.float32), axis=1)
        - jnp.take_along_axis(
            logits_bf16.astype(jnp.float32), labels[:, None], axis=1)[:, 0]
    )
    assert jnp.allclose(loss_bf16, ref_bf16, rtol=3e-2, atol=3e-2), (loss_bf16, ref_bf16)

    # --- multi-tile + ragged-tail path (no host pad): batch=1000, classes=128 ---
    N2, C2 = 1000, 128
    logits2 = jax.random.normal(k_logits2, (N2, C2), dtype=jnp.float32)
    labels2 = jax.random.randint(k_labels2, (N2,), 0, C2, dtype=jnp.int32)
    loss2 = jax.block_until_ready(module.loss(logits2, labels2, reduction="sum"))
    ref2 = jnp.sum(
        jax.nn.logsumexp(logits2, axis=1)
        - jnp.take_along_axis(logits2, labels2[:, None], axis=1)[:, 0]
    )
    assert jnp.allclose(loss2, ref2, rtol=1e-5, atol=1e-3), (loss2, ref2)

    print("KERNEL_OK")
</pallas_src>

<mosaic_0001>
module attributes {stable_mosaic.version = 11 : i64} {
  func.func @_ce_partial_kernel(%arg0: i32, %arg1: memref<16x32xf32, #tpu.memory_space<vmem>>, %arg2: memref<16x1xi32, #tpu.memory_space<vmem>>, %arg3: memref<1x1xf32, #tpu.memory_space<smem>>) attributes {dimension_semantics = [#tpu.dimension_semantics<parallel>], iteration_bounds = array<i64: 1>, scalar_prefetch = 0 : i64, scratch_operands = 0 : i64, tpu.core_type = #tpu.core_type<tc>, window_params = [{transform_indices = @transform_0, window_bounds = array<i64: 16, 32>}, {transform_indices = @transform_1, window_bounds = array<i64: 16, 1>}, {transform_indices = @transform_2, window_bounds = array<i64: 1, 1>}]} {
    %c0 = arith.constant 0 : index
    %c0_0 = arith.constant 0 : index
    %0 = vector.load %arg1[%c0, %c0_0] : memref<16x32xf32, #tpu.memory_space<vmem>>, vector<16x32xf32>
    %c0_1 = arith.constant 0 : index
    %c0_2 = arith.constant 0 : index
    %1 = vector.load %arg2[%c0_1, %c0_2] : memref<16x1xi32, #tpu.memory_space<vmem>>, vector<16x1xi32>
    %2 = tpu.iota {dimensions = array<i32: 0>} : vector<16x1xi32>
    %c16_i32 = arith.constant 16 : i32
    %3 = arith.muli %arg0, %c16_i32 : i32
    %4 = vector.broadcast %3 : i32 to vector<16x1xi32>
    %5 = arith.addi %2, %4 : vector<16x1xi32>
    %c8_i32 = arith.constant 8 : i32
    %6 = vector.broadcast %c8_i32 : i32 to vector<16x1xi32>
    %7 = arith.cmpi slt, %5, %6 : vector<16x1xi32>
    %cst = arith.constant dense<0xFF800000> : vector<16xf32>
    %8 = vector.multi_reduction <maximumf>, %0, %cst [1] : vector<16x32xf32> to vector<16xf32>
    %9 = vector.shape_cast %8 : vector<16xf32> to vector<16x1xf32>
    %10 = vector.broadcast %9 : vector<16x1xf32> to vector<16x32xf32>
    %11 = arith.subf %0, %10 : vector<16x32xf32>
    %12 = tpu.iota {dimensions = array<i32: 1>} : vector<16x32xi32>
    %13 = vector.broadcast %1 : vector<16x1xi32> to vector<16x32xi32>
    %14 = arith.cmpi eq, %12, %13 : vector<16x32xi32>
    %cst_3 = arith.constant 0.000000e+00 : f32
    %15 = vector.broadcast %cst_3 : f32 to vector<16x32xf32>
    %16 = arith.select %14, %11, %15 : vector<16x32xi1>, vector<16x32xf32>
    %cst_4 = arith.constant dense<0.000000e+00> : vector<16xf32>
    %17 = vector.multi_reduction <add>, %16, %cst_4 [1] : vector<16x32xf32> to vector<16xf32>
    %18 = vector.shape_cast %17 : vector<16xf32> to vector<16x1xf32>
    %19 = math.exp %11 : vector<16x32xf32>
    %cst_5 = arith.constant dense<0.000000e+00> : vector<16xf32>
    %20 = vector.multi_reduction <add>, %19, %cst_5 [1] : vector<16x32xf32> to vector<16xf32>
    %21 = vector.shape_cast %20 : vector<16xf32> to vector<16x1xf32>
    %22 = math.log %21 : vector<16x1xf32>
    %23 = arith.subf %22, %18 : vector<16x1xf32>
    %cst_6 = arith.constant 0.000000e+00 : f32
    %24 = vector.broadcast %cst_6 : f32 to vector<16x1xf32>
    %25 = arith.select %7, %23, %24 : vector<16x1xi1>, vector<16x1xf32>
    %26 = vector.shape_cast %25 : vector<16x1xf32> to vector<1x16x1xf32>
    %cst_7 = arith.constant dense<0.000000e+00> : vector<1xf32>
    %27 = vector.multi_reduction <add>, %26, %cst_7 [1, 2] : vector<1x16x1xf32> to vector<1xf32>
    %28 = vector.shape_cast %27 : vector<1xf32> to vector<1x1x1xf32>
    %29 = vector.extract %28[0, 0, 0] : f32 from vector<1x1x1xf32>
    %c0_8 = arith.constant 0 : index
    %c0_9 = arith.constant 0 : index
    %30 = memref.load %arg3[%c0_8, %c0_9] : memref<1x1xf32, #tpu.memory_space<smem>>
    memref.store %29, %arg3[%c0_8, %c0_9] : memref<1x1xf32, #tpu.memory_space<smem>>
    return
  }
  func.func @transform_0(%arg0: i32) -> (i32, i32) {
    %c0_i32 = arith.constant 0 : i32
    %c0_i32_0 = arith.constant 0 : i32
    return %arg0, %c0_i32 : i32, i32
  }
  func.func @transform_1(%arg0: i32) -> (i32, i32) {
    %c0_i32 = arith.constant 0 : i32
    %c0_i32_0 = arith.constant 0 : i32
    return %arg0, %c0_i32 : i32, i32
  }
  func.func @transform_2(%arg0: i32) -> (i32, i32) {
    %c0_i32 = arith.constant 0 : i32
    %c0_i32_0 = arith.constant 0 : i32
    return %arg0, %c0_i32 : i32, i32
  }
}

</mosaic_0001>

<bundles_post_ra>
// kernel: tpu_custom_call.1
= control target key start
LH: loop header
LB: loop body
LE: loop exit
PB: predicated region body
PF: predicated region fallthrough
CT: control target
= control target key end

     0   :  { %vm25_vm0 = vcmask 261120   ;;  %s146_s0 = inlined_call_operand.vmem [shape: f32[16,32], index: 0, kind: input, shape index: {}]   ;;  %s147_s1 = inlined_call_operand.vmem [shape: s32[16,1], index: 1, kind: input, shape index: {}]   ;;  %s148_s2 = inlined_call_operand.hbm [shape: f32[1,1], index: 2, kind: output, shape index: {}]  }
   0x1   :  { %v12_v0 = vld [vmem:[%s146_s0] sm:$0xff] }
   0x2   :  { %7 = vsyncpa [#allocation3], 0  ;;  %v26_v1 = vsel %vm25_vm0, %v12_v0, -inf  ;;  %v117_v2 = vmov 0   ;;  %v14_v3 = vld [vmem:[%s147_s1] sm:$0xff]  ;;  %v34_v7 = vlaneseq  ;;  %vm70_vm2 = vcmask 7168  }
   0x3   :  { %102 = vset.pattern.permute.xlu0 %v117_v2  ;;  %s118_s1 = smov [#allocation2]  }
   0x4   :  { %27 = vmax.xlane.f32.xlu0 %v26_v1  ;;  %v35_v8 = vand.u32 127, %v34_v7 }
  0x1a   :  { %37 = vperm.xlu0 %102, %v14_v3  }
  0x8d   :  { %v28_v4 = vpop.xlane.xlu0 %27 }
  0x8e   :  { %v32_v5 = vsub.f32 %v12_v0, %v28_v4 }
  0x90   :  { %v52_v6 = vmul.f32 1.442695, %v32_v5 }
  0x92   :  { %103 = vpow2.f32 %v52_v6 }
  0x95   :  { %v38_v9 = vpop.permute.xlu0 %37 }
  0x96   :  { %vm42_vm1 = vcmp.eq.s32.totalorder %v35_v8, %v38_v9 }
  0x97   :  { %v44_v12 = vsel %vm42_vm1, %v32_v5, 0.0 }
  0x98   :  { %v46_v13 = vsel %vm25_vm0, %v44_v12, 0.0 }
  0x9f   :  { %v104_v10 = vpop.eup %103 }
  0xa0   :  { %v56_v11 = vsel %vm25_vm0, %v104_v10, 0.0 }
  0xa1   :  { %57 = vadd.xlane.f32.xlu1 %v56_v11 }
  0xa5   :  { %47 = vadd.xlane.f32.xlu1 %v46_v13 }
 0x12a   :  { %v58_v14 = vpop.xlane.xlu1 %57 }
 0x12b   :  { %105 = vlog2.f32 %v58_v14 }
 0x12e   :  { %v48_v17 = vpop.xlane.xlu1 %47 }
 0x138   :  { %v106_v15 = vpop.eup %105 }
 0x139   :  { %v63_v16 = vmul.f32 0.6931472, %v106_v15 }
 0x13b   :  { %v66_v18 = vsub.f32 %v63_v16, %v48_v17 }
 0x13d   :  { %v71_v19 = vsel %vm70_vm2, %v66_v18, 0.0 }
 0x13e   :  { %74 = vadd.xlane.f32.xlu1 %v71_v19 }
 0x1c7   :  { %v75_v20 = vpop.xlane.xlu1 %74 }
 0x1c8   :  { %v76_v21 = vrot.slane %v75_v20, 4 }
 0x1ca   :  { %v77_v22 = vadd.f32 %v76_v21, %v75_v20 }
 0x1cc   :  { %v78_v23 = vrot.slane %v77_v22, 2 }
 0x1ce   :  { %v79_v24 = vadd.f32 %v78_v23, %v77_v22 }
 0x1d0   :  { %v80_v25 = vrot.slane %v79_v24, 1 }
 0x1d2   :  { %v81_v26 = vadd.f32 %v80_v25, %v79_v24 }
 0x1d4   :  { %98 = vpush %v81_v26 }
 0x205   :  { %s99_s0 = spop %98 }
 0x206   :  { %84 = sst [smem:[#allocation2]] %s99_s0 }
 0x207   :  { %92 = dma.smem_to_hbm %s118_s1, 16, %s148_s2, [#allocation3]  }
 0x208   :  { %115 = dma.done.wait [#allocation3], 16  }
 0x209   :  { %116 = vsyncadd [#allocation3], 4294967280 }
 0x20a   :  { %96 = sfence }
 0x20b   :  { %97 = vsyncpa [#allocation3], 1 }

</bundles_post_ra>
